<compile_context>
chip_gen: v7x
topology: tpu7x:2x2x1
jax: 0.10.0
libtpu: 0.0.40
codegen_flags: <defaults>
</compile_context>

<pallas_src>
import functools

import jax
import jax.numpy as jnp
from jax import lax
from jax.experimental import pallas as pl
from jax.experimental.pallas import tpu as pltpu


def mha_kernel(x_ref, wqkv_ref, bqkv_ref, wo_ref, bo_ref, o_ref, *, B, S, H, hs):
    f32 = jnp.float32
    bf16 = jnp.bfloat16
    Hh = H * hs

    x = x_ref[...]                                      # (B*S, E) bf16

    # Fused QKV projection: one lane-dense MXU matmul with f32 accumulation.
    # (1/sqrt(hs) is already folded into the Q columns by the wrapper.)
    qkv = jnp.dot(x, wqkv_ref[...], preferred_element_type=f32)
    qkv = qkv + bqkv_ref[...].astype(f32)               # (B*S, 3*H*hs)

    # Causal mask, built once (hoisted out of the per-(batch, head) loop).
    rows = lax.broadcasted_iota(jnp.int32, (S, S), 0)
    cols = lax.broadcasted_iota(jnp.int32, (S, S), 1)
    causal = rows >= cols
    neg_big = jnp.float32(-1e30)                        # finite: NaN-safe masking

    # Attention per (batch, head): static unroll, tiny tiles (hs=8 -> this path
    # is VPU/overhead bound by construction; MXU feeding happens in the two
    # fused projections above/below).
    per_batch = []
    for b in range(B):
        r0 = b * S
        heads = []
        for h in range(H):
            c0 = h * hs
            q = qkv[r0:r0 + S, c0:c0 + hs].astype(bf16)                 # (S, hs)
            k = qkv[r0:r0 + S, Hh + c0:Hh + c0 + hs].astype(bf16)       # (S, hs)
            v = qkv[r0:r0 + S, 2 * Hh + c0:2 * Hh + c0 + hs].astype(bf16)

            s = jnp.einsum('qd,kd->qk', q, k, preferred_element_type=f32)
            s = jnp.where(causal, s, neg_big)

            m = jnp.max(s, axis=-1, keepdims=True)
            e = jnp.exp(s - m)
            denom = jnp.sum(e, axis=-1, keepdims=True)
            p = e * pl.reciprocal(denom, approx=True)    # EUP, not a VPU divide
            # attention-weight dropout: identity (inference mode)

            o = jnp.einsum('qk,kd->qd', p.astype(bf16), v,
                           preferred_element_type=f32)   # (S, hs)
            heads.append(o.astype(bf16))
        per_batch.append(jnp.concatenate(heads, axis=-1))               # (S, H*hs)
    cat = jnp.concatenate(per_batch, axis=0)                            # (B*S, H*hs)

    # "Concat heads + output Linear" as one (B*S, H*hs) @ (H*hs, E) MXU matmul.
    y = jnp.dot(cat, wo_ref[...], preferred_element_type=f32)
    y = y + bo_ref[...].astype(f32)
    # output dropout: identity (inference mode)

    o_ref[...] = y.astype(o_ref.dtype)


def multi_head_attention(x, params):
    """x: (B, S, E) f32.  params in the per-head layout of the PyTorch module."""
    wq, bq, wk, bk, wv, bv, wo, bo = params
    H, E, hs = wq.shape
    B, S, _ = x.shape
    Hh = H * hs
    out_dtype = x.dtype

    # Fold the attention scale into the Q projection (free at weight-prep time).
    scale = float(hs) ** -0.5
    wq_s = wq * scale
    bq_s = bq * scale

    def to2d(w):  # (H, E, hs) -> (E, H*hs), head-major columns
        return jnp.transpose(w, (1, 0, 2)).reshape(E, Hh)

    w_qkv = jnp.concatenate([to2d(wq_s), to2d(wk), to2d(wv)], axis=-1)   # (E, 3*H*hs)
    b_qkv = jnp.concatenate([bq_s.reshape(1, Hh), bk.reshape(1, Hh),
                             bv.reshape(1, Hh)], axis=-1)                # (1, 3*H*hs)
    w_o = wo.reshape(Hh, E)                                              # (H*hs, E)
    b_o = bo.reshape(1, E)                                               # (1, E)

    # bf16 MXU inputs (native on v5e/v6e/v7x); accumulation stays f32 in-kernel.
    cdt = jnp.bfloat16
    x2d = x.reshape(B * S, E).astype(cdt)        # fold batch into the sublane dim
    w_qkv = w_qkv.astype(cdt)
    b_qkv = b_qkv.astype(cdt)
    w_o = w_o.astype(cdt)
    b_o = b_o.astype(cdt)

    kernel = functools.partial(mha_kernel, B=B, S=S, H=H, hs=hs)

    def full_spec(a):
        nd = a.ndim
        return pl.BlockSpec(a.shape, lambda i, _nd=nd: (0,) * _nd)

    y2d = pl.pallas_call(
        kernel,
        out_shape=jax.ShapeDtypeStruct((B * S, E), out_dtype),
        grid_spec=pltpu.PrefetchScalarGridSpec(
            num_scalar_prefetch=0,
            grid=(1,),                       # whole batch in a single grid step
            in_specs=[
                full_spec(x2d),
                full_spec(w_qkv), full_spec(b_qkv),
                full_spec(w_o), full_spec(b_o),
            ],
            out_specs=pl.BlockSpec((B * S, E), lambda i: (0, 0)),
        ),
        compiler_params=pltpu.CompilerParams(
            dimension_semantics=("arbitrary",)),
    )(x2d, w_qkv, b_qkv, w_o, b_o)

    return y2d.reshape(B, S, E)


def reference_mha(x, params):
    """Pure-JAX f32 reference mirroring the PyTorch module in eval mode."""
    wq, bq, wk, bk, wv, bv, wo, bo = params
    H, E, hs = wq.shape
    B, S, _ = x.shape
    q = jnp.einsum('bse,hed->bhsd', x, wq) + bq[None, :, None, :]
    k = jnp.einsum('bse,hed->bhsd', x, wk) + bk[None, :, None, :]
    v = jnp.einsum('bse,hed->bhsd', x, wv) + bv[None, :, None, :]
    scores = jnp.einsum('bhqd,bhkd->bhqk', q, k) * (hs ** -0.5)
    mask = jnp.tril(jnp.ones((S, S), bool))
    scores = jnp.where(mask[None, None], scores, -jnp.inf)
    p = jax.nn.softmax(scores, axis=-1)
    out = jnp.einsum('bhqk,bhkd->bhqd', p, v)
    y = jnp.einsum('bhqd,hde->bqe', out, wo) + bo[0]
    return y


def init_params(key, n_heads, head_size, embed_size):
    ks = jax.random.split(key, 8)
    f32 = jnp.float32
    wq = jax.random.normal(ks[0], (n_heads, embed_size, head_size), f32) * (embed_size ** -0.5)
    bq = jax.random.normal(ks[1], (n_heads, head_size), f32) * 0.02
    wk = jax.random.normal(ks[2], (n_heads, embed_size, head_size), f32) * (embed_size ** -0.5)
    bk = jax.random.normal(ks[3], (n_heads, head_size), f32) * 0.02
    wv = jax.random.normal(ks[4], (n_heads, embed_size, head_size), f32) * (embed_size ** -0.5)
    bv = jax.random.normal(ks[5], (n_heads, head_size), f32) * 0.02
    wo = jax.random.normal(ks[6], (n_heads, head_size, embed_size), f32) * ((n_heads * head_size) ** -0.5)
    bo = jax.random.normal(ks[7], (1, embed_size), f32) * 0.02
    return (wq, bq, wk, bk, wv, bv, wo, bo)


if __name__ == "__main__":
    # n_heads=4, head_size=8, embed_size=32, context (== seq len) = 8, batch = 2, BAIS=True.
    B, S, E = 2, 8, 32
    n_heads, head_size = 4, 8

    key = jax.random.PRNGKey(0)
    kx, kp = jax.random.split(key)
    x = jax.random.normal(kx, (B, S, E), jnp.float32)
    params = init_params(kp, n_heads, head_size, E)

    y = multi_head_attention(x, params)
    y = jax.block_until_ready(y)

    # Compare against an f32 reference on bf16-rounded inputs (the kernel feeds
    # the MXU bf16 with f32 accumulation and uses an approximate reciprocal).
    quant = lambda a: a.astype(jnp.bfloat16).astype(jnp.float32)
    y_ref = reference_mha(quant(x), tuple(quant(p) for p in params))

    assert y.shape == (B, S, E)
    assert jnp.allclose(y.astype(jnp.float32), y_ref, rtol=2e-2, atol=2e-2), "mismatch vs reference"

    print("KERNEL_OK")
</pallas_src>

<mosaic_0001>
module attributes {stable_mosaic.version = 11 : i64} {
  func.func @mha_kernel(%arg0: i32, %arg1: memref<16x32xbf16, #tpu.memory_space<vmem>>, %arg2: memref<32x96xbf16, #tpu.memory_space<vmem>>, %arg3: memref<1x96xbf16, #tpu.memory_space<vmem>>, %arg4: memref<32x32xbf16, #tpu.memory_space<vmem>>, %arg5: memref<1x32xbf16, #tpu.memory_space<vmem>>, %arg6: memref<16x32xf32, #tpu.memory_space<vmem>>) attributes {dimension_semantics = [#tpu.dimension_semantics<arbitrary>], iteration_bounds = array<i64: 1>, scalar_prefetch = 0 : i64, scratch_operands = 0 : i64, tpu.core_type = #tpu.core_type<tc>, window_params = [{pipeline_mode = #tpu.pipeline_mode<synchronous>, transform_indices = @transform_0, window_bounds = array<i64: 16, 32>}, {pipeline_mode = #tpu.pipeline_mode<synchronous>, transform_indices = @transform_1, window_bounds = array<i64: 32, 96>}, {pipeline_mode = #tpu.pipeline_mode<synchronous>, transform_indices = @transform_2, window_bounds = array<i64: 1, 96>}, {pipeline_mode = #tpu.pipeline_mode<synchronous>, transform_indices = @transform_3, window_bounds = array<i64: 32, 32>}, {pipeline_mode = #tpu.pipeline_mode<synchronous>, transform_indices = @transform_4, window_bounds = array<i64: 1, 32>}, {pipeline_mode = #tpu.pipeline_mode<synchronous>, transform_indices = @transform_5, window_bounds = array<i64: 16, 32>}]} {
    %c0 = arith.constant 0 : index
    %c0_0 = arith.constant 0 : index
    %0 = vector.load %arg1[%c0, %c0_0] : memref<16x32xbf16, #tpu.memory_space<vmem>>, vector<16x32xbf16>
    %c0_1 = arith.constant 0 : index
    %c0_2 = arith.constant 0 : index
    %1 = vector.load %arg2[%c0_1, %c0_2] : memref<32x96xbf16, #tpu.memory_space<vmem>>, vector<32x96xbf16>
    %cst = arith.constant dense<0.000000e+00> : vector<16x96xf32>
    %2 = tpu.matmul %0, %1, %cst {dimension_numbers = #tpu.dot_dimension_numbers<[1], [0], [0], [1], [0, 0, 1, 1], [], []>} : vector<16x32xbf16>, vector<32x96xbf16>, vector<16x96xf32> -> vector<16x96xf32>
    %c0_3 = arith.constant 0 : index
    %c0_4 = arith.constant 0 : index
    %3 = vector.load %arg3[%c0_3, %c0_4] : memref<1x96xbf16, #tpu.memory_space<vmem>>, vector<1x96xbf16>
    %4 = arith.extf %3 : vector<1x96xbf16> to vector<1x96xf32>
    %5 = vector.broadcast %4 : vector<1x96xf32> to vector<16x96xf32>
    %6 = arith.addf %2, %5 : vector<16x96xf32>
    %7 = tpu.iota {dimensions = array<i32: 0>} : vector<8x8xi32>
    %8 = tpu.iota {dimensions = array<i32: 1>} : vector<8x8xi32>
    %9 = arith.cmpi sge, %7, %8 : vector<8x8xi32>
    %10 = vector.extract_strided_slice %6 {offsets = [0, 0], sizes = [8, 8], strides = [1, 1]} : vector<16x96xf32> to vector<8x8xf32>
    %11 = arith.truncf %10 : vector<8x8xf32> to vector<8x8xbf16>
    %12 = vector.extract_strided_slice %6 {offsets = [0, 32], sizes = [8, 8], strides = [1, 1]} : vector<16x96xf32> to vector<8x8xf32>
    %13 = arith.truncf %12 : vector<8x8xf32> to vector<8x8xbf16>
    %14 = vector.extract_strided_slice %6 {offsets = [0, 64], sizes = [8, 8], strides = [1, 1]} : vector<16x96xf32> to vector<8x8xf32>
    %15 = arith.truncf %14 : vector<8x8xf32> to vector<8x8xbf16>
    "tpu.trace_start"() <{level = 10 : i32, message = "qd,kd->qk"}> : () -> ()
    %cst_5 = arith.constant dense<0.000000e+00> : vector<8x8xf32>
    %16 = tpu.matmul %11, %13, %cst_5 {dimension_numbers = #tpu.dot_dimension_numbers<[1], [1], [0], [0], [0, 0, 1, 0], [], []>} : vector<8x8xbf16>, vector<8x8xbf16>, vector<8x8xf32> -> vector<8x8xf32>
    %cst_6 = arith.constant -1.000000e+30 : f32
    "tpu.trace_stop"() : () -> ()
    %17 = vector.broadcast %cst_6 : f32 to vector<8x8xf32>
    %18 = arith.select %9, %16, %17 : vector<8x8xi1>, vector<8x8xf32>
    %cst_7 = arith.constant dense<0xFF800000> : vector<8xf32>
    %19 = vector.multi_reduction <maximumf>, %18, %cst_7 [1] : vector<8x8xf32> to vector<8xf32>
    %20 = vector.shape_cast %19 : vector<8xf32> to vector<8x1xf32>
    %21 = vector.broadcast %20 : vector<8x1xf32> to vector<8x8xf32>
    %22 = arith.subf %18, %21 : vector<8x8xf32>
    %23 = math.exp %22 : vector<8x8xf32>
    %cst_8 = arith.constant dense<0.000000e+00> : vector<8xf32>
    %24 = vector.multi_reduction <add>, %23, %cst_8 [1] : vector<8x8xf32> to vector<8xf32>
    %25 = vector.shape_cast %24 : vector<8xf32> to vector<8x1xf32>
    %26 = tpu.reciprocal %25 {approx = true} : vector<8x1xf32> -> vector<8x1xf32>
    %27 = vector.broadcast %26 : vector<8x1xf32> to vector<8x8xf32>
    %28 = arith.mulf %23, %27 : vector<8x8xf32>
    %29 = arith.truncf %28 : vector<8x8xf32> to vector<8x8xbf16>
    "tpu.trace_start"() <{level = 10 : i32, message = "qk,kd->qd"}> : () -> ()
    %cst_9 = arith.constant dense<0.000000e+00> : vector<8x8xf32>
    %30 = tpu.matmul %29, %15, %cst_9 {dimension_numbers = #tpu.dot_dimension_numbers<[1], [0], [0], [1], [0, 0, 1, 1], [], []>} : vector<8x8xbf16>, vector<8x8xbf16>, vector<8x8xf32> -> vector<8x8xf32>
    "tpu.trace_stop"() : () -> ()
    %31 = arith.truncf %30 : vector<8x8xf32> to vector<8x8xbf16>
    %32 = vector.extract_strided_slice %6 {offsets = [0, 8], sizes = [8, 8], strides = [1, 1]} : vector<16x96xf32> to vector<8x8xf32>
    %33 = arith.truncf %32 : vector<8x8xf32> to vector<8x8xbf16>
    %34 = vector.extract_strided_slice %6 {offsets = [0, 40], sizes = [8, 8], strides = [1, 1]} : vector<16x96xf32> to vector<8x8xf32>
    %35 = arith.truncf %34 : vector<8x8xf32> to vector<8x8xbf16>
    %36 = vector.extract_strided_slice %6 {offsets = [0, 72], sizes = [8, 8], strides = [1, 1]} : vector<16x96xf32> to vector<8x8xf32>
    %37 = arith.truncf %36 : vector<8x8xf32> to vector<8x8xbf16>
    "tpu.trace_start"() <{level = 10 : i32, message = "qd,kd->qk"}> : () -> ()
    %cst_10 = arith.constant dense<0.000000e+00> : vector<8x8xf32>
    %38 = tpu.matmul %33, %35, %cst_10 {dimension_numbers = #tpu.dot_dimension_numbers<[1], [1], [0], [0], [0, 0, 1, 0], [], []>} : vector<8x8xbf16>, vector<8x8xbf16>, vector<8x8xf32> -> vector<8x8xf32>
    %cst_11 = arith.constant -1.000000e+30 : f32
    "tpu.trace_stop"() : () -> ()
    %39 = vector.broadcast %cst_11 : f32 to vector<8x8xf32>
    %40 = arith.select %9, %38, %39 : vector<8x8xi1>, vector<8x8xf32>
    %cst_12 = arith.constant dense<0xFF800000> : vector<8xf32>
    %41 = vector.multi_reduction <maximumf>, %40, %cst_12 [1] : vector<8x8xf32> to vector<8xf32>
    %42 = vector.shape_cast %41 : vector<8xf32> to vector<8x1xf32>
    %43 = vector.broadcast %42 : vector<8x1xf32> to vector<8x8xf32>
    %44 = arith.subf %40, %43 : vector<8x8xf32>
    %45 = math.exp %44 : vector<8x8xf32>
    %cst_13 = arith.constant dense<0.000000e+00> : vector<8xf32>
    %46 = vector.multi_reduction <add>, %45, %cst_13 [1] : vector<8x8xf32> to vector<8xf32>
    %47 = vector.shape_cast %46 : vector<8xf32> to vector<8x1xf32>
    %48 = tpu.reciprocal %47 {approx = true} : vector<8x1xf32> -> vector<8x1xf32>
    %49 = vector.broadcast %48 : vector<8x1xf32> to vector<8x8xf32>
    %50 = arith.mulf %45, %49 : vector<8x8xf32>
    %51 = arith.truncf %50 : vector<8x8xf32> to vector<8x8xbf16>
    "tpu.trace_start"() <{level = 10 : i32, message = "qk,kd->qd"}> : () -> ()
    %cst_14 = arith.constant dense<0.000000e+00> : vector<8x8xf32>
    %52 = tpu.matmul %51, %37, %cst_14 {dimension_numbers = #tpu.dot_dimension_numbers<[1], [0], [0], [1], [0, 0, 1, 1], [], []>} : vector<8x8xbf16>, vector<8x8xbf16>, vector<8x8xf32> -> vector<8x8xf32>
    "tpu.trace_stop"() : () -> ()
    %53 = arith.truncf %52 : vector<8x8xf32> to vector<8x8xbf16>
    %54 = vector.extract_strided_slice %6 {offsets = [0, 16], sizes = [8, 8], strides = [1, 1]} : vector<16x96xf32> to vector<8x8xf32>
    %55 = arith.truncf %54 : vector<8x8xf32> to vector<8x8xbf16>
    %56 = vector.extract_strided_slice %6 {offsets = [0, 48], sizes = [8, 8], strides = [1, 1]} : vector<16x96xf32> to vector<8x8xf32>
    %57 = arith.truncf %56 : vector<8x8xf32> to vector<8x8xbf16>
    %58 = vector.extract_strided_slice %6 {offsets = [0, 80], sizes = [8, 8], strides = [1, 1]} : vector<16x96xf32> to vector<8x8xf32>
    %59 = arith.truncf %58 : vector<8x8xf32> to vector<8x8xbf16>
    "tpu.trace_start"() <{level = 10 : i32, message = "qd,kd->qk"}> : () -> ()
    %cst_15 = arith.constant dense<0.000000e+00> : vector<8x8xf32>
    %60 = tpu.matmul %55, %57, %cst_15 {dimension_numbers = #tpu.dot_dimension_numbers<[1], [1], [0], [0], [0, 0, 1, 0], [], []>} : vector<8x8xbf16>, vector<8x8xbf16>, vector<8x8xf32> -> vector<8x8xf32>
    %cst_16 = arith.constant -1.000000e+30 : f32
    "tpu.trace_stop"() : () -> ()
    %61 = vector.broadcast %cst_16 : f32 to vector<8x8xf32>
    %62 = arith.select %9, %60, %61 : vector<8x8xi1>, vector<8x8xf32>
    %cst_17 = arith.constant dense<0xFF800000> : vector<8xf32>
    %63 = vector.multi_reduction <maximumf>, %62, %cst_17 [1] : vector<8x8xf32> to vector<8xf32>
    %64 = vector.shape_cast %63 : vector<8xf32> to vector<8x1xf32>
    %65 = vector.broadcast %64 : vector<8x1xf32> to vector<8x8xf32>
    %66 = arith.subf %62, %65 : vector<8x8xf32>
    %67 = math.exp %66 : vector<8x8xf32>
    %cst_18 = arith.constant dense<0.000000e+00> : vector<8xf32>
    %68 = vector.multi_reduction <add>, %67, %cst_18 [1] : vector<8x8xf32> to vector<8xf32>
    %69 = vector.shape_cast %68 : vector<8xf32> to vector<8x1xf32>
    %70 = tpu.reciprocal %69 {approx = true} : vector<8x1xf32> -> vector<8x1xf32>
    %71 = vector.broadcast %70 : vector<8x1xf32> to vector<8x8xf32>
    %72 = arith.mulf %67, %71 : vector<8x8xf32>
    %73 = arith.truncf %72 : vector<8x8xf32> to vector<8x8xbf16>
    "tpu.trace_start"() <{level = 10 : i32, message = "qk,kd->qd"}> : () -> ()
    %cst_19 = arith.constant dense<0.000000e+00> : vector<8x8xf32>
    %74 = tpu.matmul %73, %59, %cst_19 {dimension_numbers = #tpu.dot_dimension_numbers<[1], [0], [0], [1], [0, 0, 1, 1], [], []>} : vector<8x8xbf16>, vector<8x8xbf16>, vector<8x8xf32> -> vector<8x8xf32>
    "tpu.trace_stop"() : () -> ()
    %75 = arith.truncf %74 : vector<8x8xf32> to vector<8x8xbf16>
    %76 = vector.extract_strided_slice %6 {offsets = [0, 24], sizes = [8, 8], strides = [1, 1]} : vector<16x96xf32> to vector<8x8xf32>
    %77 = arith.truncf %76 : vector<8x8xf32> to vector<8x8xbf16>
    %78 = vector.extract_strided_slice %6 {offsets = [0, 56], sizes = [8, 8], strides = [1, 1]} : vector<16x96xf32> to vector<8x8xf32>
    %79 = arith.truncf %78 : vector<8x8xf32> to vector<8x8xbf16>
    %80 = vector.extract_strided_slice %6 {offsets = [0, 88], sizes = [8, 8], strides = [1, 1]} : vector<16x96xf32> to vector<8x8xf32>
    %81 = arith.truncf %80 : vector<8x8xf32> to vector<8x8xbf16>
    "tpu.trace_start"() <{level = 10 : i32, message = "qd,kd->qk"}> : () -> ()
    %cst_20 = arith.constant dense<0.000000e+00> : vector<8x8xf32>
    %82 = tpu.matmul %77, %79, %cst_20 {dimension_numbers = #tpu.dot_dimension_numbers<[1], [1], [0], [0], [0, 0, 1, 0], [], []>} : vector<8x8xbf16>, vector<8x8xbf16>, vector<8x8xf32> -> vector<8x8xf32>
    %cst_21 = arith.constant -1.000000e+30 : f32
    "tpu.trace_stop"() : () -> ()
    %83 = vector.broadcast %cst_21 : f32 to vector<8x8xf32>
    %84 = arith.select %9, %82, %83 : vector<8x8xi1>, vector<8x8xf32>
    %cst_22 = arith.constant dense<0xFF800000> : vector<8xf32>
    %85 = vector.multi_reduction <maximumf>, %84, %cst_22 [1] : vector<8x8xf32> to vector<8xf32>
    %86 = vector.shape_cast %85 : vector<8xf32> to vector<8x1xf32>
    %87 = vector.broadcast %86 : vector<8x1xf32> to vector<8x8xf32>
    %88 = arith.subf %84, %87 : vector<8x8xf32>
    %89 = math.exp %88 : vector<8x8xf32>
    %cst_23 = arith.constant dense<0.000000e+00> : vector<8xf32>
    %90 = vector.multi_reduction <add>, %89, %cst_23 [1] : vector<8x8xf32> to vector<8xf32>
    %91 = vector.shape_cast %90 : vector<8xf32> to vector<8x1xf32>
    %92 = tpu.reciprocal %91 {approx = true} : vector<8x1xf32> -> vector<8x1xf32>
    %93 = vector.broadcast %92 : vector<8x1xf32> to vector<8x8xf32>
    %94 = arith.mulf %89, %93 : vector<8x8xf32>
    %95 = arith.truncf %94 : vector<8x8xf32> to vector<8x8xbf16>
    "tpu.trace_start"() <{level = 10 : i32, message = "qk,kd->qd"}> : () -> ()
    %cst_24 = arith.constant dense<0.000000e+00> : vector<8x8xf32>
    %96 = tpu.matmul %95, %81, %cst_24 {dimension_numbers = #tpu.dot_dimension_numbers<[1], [0], [0], [1], [0, 0, 1, 1], [], []>} : vector<8x8xbf16>, vector<8x8xbf16>, vector<8x8xf32> -> vector<8x8xf32>
    "tpu.trace_stop"() : () -> ()
    %97 = arith.truncf %96 : vector<8x8xf32> to vector<8x8xbf16>
    %98 = tpu.concatenate %31, %53, %75, %97 in 1 : vector<8x8xbf16>, vector<8x8xbf16>, vector<8x8xbf16>, vector<8x8xbf16> -> vector<8x32xbf16>
    %99 = vector.extract_strided_slice %6 {offsets = [8, 0], sizes = [8, 8], strides = [1, 1]} : vector<16x96xf32> to vector<8x8xf32>
    %100 = arith.truncf %99 : vector<8x8xf32> to vector<8x8xbf16>
    %101 = vector.extract_strided_slice %6 {offsets = [8, 32], sizes = [8, 8], strides = [1, 1]} : vector<16x96xf32> to vector<8x8xf32>
    %102 = arith.truncf %101 : vector<8x8xf32> to vector<8x8xbf16>
    %103 = vector.extract_strided_slice %6 {offsets = [8, 64], sizes = [8, 8], strides = [1, 1]} : vector<16x96xf32> to vector<8x8xf32>
    %104 = arith.truncf %103 : vector<8x8xf32> to vector<8x8xbf16>
    "tpu.trace_start"() <{level = 10 : i32, message = "qd,kd->qk"}> : () -> ()
    %cst_25 = arith.constant dense<0.000000e+00> : vector<8x8xf32>
    %105 = tpu.matmul %100, %102, %cst_25 {dimension_numbers = #tpu.dot_dimension_numbers<[1], [1], [0], [0], [0, 0, 1, 0], [], []>} : vector<8x8xbf16>, vector<8x8xbf16>, vector<8x8xf32> -> vector<8x8xf32>
    %cst_26 = arith.constant -1.000000e+30 : f32
    "tpu.trace_stop"() : () -> ()
    %106 = vector.broadcast %cst_26 : f32 to vector<8x8xf32>
    %107 = arith.select %9, %105, %106 : vector<8x8xi1>, vector<8x8xf32>
    %cst_27 = arith.constant dense<0xFF800000> : vector<8xf32>
    %108 = vector.multi_reduction <maximumf>, %107, %cst_27 [1] : vector<8x8xf32> to vector<8xf32>
    %109 = vector.shape_cast %108 : vector<8xf32> to vector<8x1xf32>
    %110 = vector.broadcast %109 : vector<8x1xf32> to vector<8x8xf32>
    %111 = arith.subf %107, %110 : vector<8x8xf32>
    %112 = math.exp %111 : vector<8x8xf32>
    %cst_28 = arith.constant dense<0.000000e+00> : vector<8xf32>
    %113 = vector.multi_reduction <add>, %112, %cst_28 [1] : vector<8x8xf32> to vector<8xf32>
    %114 = vector.shape_cast %113 : vector<8xf32> to vector<8x1xf32>
    %115 = tpu.reciprocal %114 {approx = true} : vector<8x1xf32> -> vector<8x1xf32>
    %116 = vector.broadcast %115 : vector<8x1xf32> to vector<8x8xf32>
    %117 = arith.mulf %112, %116 : vector<8x8xf32>
    %118 = arith.truncf %117 : vector<8x8xf32> to vector<8x8xbf16>
    "tpu.trace_start"() <{level = 10 : i32, message = "qk,kd->qd"}> : () -> ()
    %cst_29 = arith.constant dense<0.000000e+00> : vector<8x8xf32>
    %119 = tpu.matmul %118, %104, %cst_29 {dimension_numbers = #tpu.dot_dimension_numbers<[1], [0], [0], [1], [0, 0, 1, 1], [], []>} : vector<8x8xbf16>, vector<8x8xbf16>, vector<8x8xf32> -> vector<8x8xf32>
    "tpu.trace_stop"() : () -> ()
    %120 = arith.truncf %119 : vector<8x8xf32> to vector<8x8xbf16>
    %121 = vector.extract_strided_slice %6 {offsets = [8, 8], sizes = [8, 8], strides = [1, 1]} : vector<16x96xf32> to vector<8x8xf32>
    %122 = arith.truncf %121 : vector<8x8xf32> to vector<8x8xbf16>
    %123 = vector.extract_strided_slice %6 {offsets = [8, 40], sizes = [8, 8], strides = [1, 1]} : vector<16x96xf32> to vector<8x8xf32>
    %124 = arith.truncf %123 : vector<8x8xf32> to vector<8x8xbf16>
    %125 = vector.extract_strided_slice %6 {offsets = [8, 72], sizes = [8, 8], strides = [1, 1]} : vector<16x96xf32> to vector<8x8xf32>
    %126 = arith.truncf %125 : vector<8x8xf32> to vector<8x8xbf16>
    "tpu.trace_start"() <{level = 10 : i32, message = "qd,kd->qk"}> : () -> ()
    %cst_30 = arith.constant dense<0.000000e+00> : vector<8x8xf32>
    %127 = tpu.matmul %122, %124, %cst_30 {dimension_numbers = #tpu.dot_dimension_numbers<[1], [1], [0], [0], [0, 0, 1, 0], [], []>} : vector<8x8xbf16>, vector<8x8xbf16>, vector<8x8xf32> -> vector<8x8xf32>
    %cst_31 = arith.constant -1.000000e+30 : f32
    "tpu.trace_stop"() : () -> ()
    %128 = vector.broadcast %cst_31 : f32 to vector<8x8xf32>
    %129 = arith.select %9, %127, %128 : vector<8x8xi1>, vector<8x8xf32>
    %cst_32 = arith.constant dense<0xFF800000> : vector<8xf32>
    %130 = vector.multi_reduction <maximumf>, %129, %cst_32 [1] : vector<8x8xf32> to vector<8xf32>
    %131 = vector.shape_cast %130 : vector<8xf32> to vector<8x1xf32>
    %132 = vector.broadcast %131 : vector<8x1xf32> to vector<8x8xf32>
    %133 = arith.subf %129, %132 : vector<8x8xf32>
    %134 = math.exp %133 : vector<8x8xf32>
    %cst_33 = arith.constant dense<0.000000e+00> : vector<8xf32>
    %135 = vector.multi_reduction <add>, %134, %cst_33 [1] : vector<8x8xf32> to vector<8xf32>
    %136 = vector.shape_cast %135 : vector<8xf32> to vector<8x1xf32>
    %137 = tpu.reciprocal %136 {approx = true} : vector<8x1xf32> -> vector<8x1xf32>
    %138 = vector.broadcast %137 : vector<8x1xf32> to vector<8x8xf32>
    %139 = arith.mulf %134, %138 : vector<8x8xf32>
    %140 = arith.truncf %139 : vector<8x8xf32> to vector<8x8xbf16>
    "tpu.trace_start"() <{level = 10 : i32, message = "qk,kd->qd"}> : () -> ()
    %cst_34 = arith.constant dense<0.000000e+00> : vector<8x8xf32>
    %141 = tpu.matmul %140, %126, %cst_34 {dimension_numbers = #tpu.dot_dimension_numbers<[1], [0], [0], [1], [0, 0, 1, 1], [], []>} : vector<8x8xbf16>, vector<8x8xbf16>, vector<8x8xf32> -> vector<8x8xf32>
    "tpu.trace_stop"() : () -> ()
    %142 = arith.truncf %141 : vector<8x8xf32> to vector<8x8xbf16>
    %143 = vector.extract_strided_slice %6 {offsets = [8, 16], sizes = [8, 8], strides = [1, 1]} : vector<16x96xf32> to vector<8x8xf32>
    %144 = arith.truncf %143 : vector<8x8xf32> to vector<8x8xbf16>
    %145 = vector.extract_strided_slice %6 {offsets = [8, 48], sizes = [8, 8], strides = [1, 1]} : vector<16x96xf32> to vector<8x8xf32>
    %146 = arith.truncf %145 : vector<8x8xf32> to vector<8x8xbf16>
    %147 = vector.extract_strided_slice %6 {offsets = [8, 80], sizes = [8, 8], strides = [1, 1]} : vector<16x96xf32> to vector<8x8xf32>
    %148 = arith.truncf %147 : vector<8x8xf32> to vector<8x8xbf16>
    "tpu.trace_start"() <{level = 10 : i32, message = "qd,kd->qk"}> : () -> ()
    %cst_35 = arith.constant dense<0.000000e+00> : vector<8x8xf32>
    %149 = tpu.matmul %144, %146, %cst_35 {dimension_numbers = #tpu.dot_dimension_numbers<[1], [1], [0], [0], [0, 0, 1, 0], [], []>} : vector<8x8xbf16>, vector<8x8xbf16>, vector<8x8xf32> -> vector<8x8xf32>
    %cst_36 = arith.constant -1.000000e+30 : f32
    "tpu.trace_stop"() : () -> ()
    %150 = vector.broadcast %cst_36 : f32 to vector<8x8xf32>
    %151 = arith.select %9, %149, %150 : vector<8x8xi1>, vector<8x8xf32>
    %cst_37 = arith.constant dense<0xFF800000> : vector<8xf32>
    %152 = vector.multi_reduction <maximumf>, %151, %cst_37 [1] : vector<8x8xf32> to vector<8xf32>
    %153 = vector.shape_cast %152 : vector<8xf32> to vector<8x1xf32>
    %154 = vector.broadcast %153 : vector<8x1xf32> to vector<8x8xf32>
    %155 = arith.subf %151, %154 : vector<8x8xf32>
    %156 = math.exp %155 : vector<8x8xf32>
    %cst_38 = arith.constant dense<0.000000e+00> : vector<8xf32>
    %157 = vector.multi_reduction <add>, %156, %cst_38 [1] : vector<8x8xf32> to vector<8xf32>
    %158 = vector.shape_cast %157 : vector<8xf32> to vector<8x1xf32>
    %159 = tpu.reciprocal %158 {approx = true} : vector<8x1xf32> -> vector<8x1xf32>
    %160 = vector.broadcast %159 : vector<8x1xf32> to vector<8x8xf32>
    %161 = arith.mulf %156, %160 : vector<8x8xf32>
    %162 = arith.truncf %161 : vector<8x8xf32> to vector<8x8xbf16>
    "tpu.trace_start"() <{level = 10 : i32, message = "qk,kd->qd"}> : () -> ()
    %cst_39 = arith.constant dense<0.000000e+00> : vector<8x8xf32>
    %163 = tpu.matmul %162, %148, %cst_39 {dimension_numbers = #tpu.dot_dimension_numbers<[1], [0], [0], [1], [0, 0, 1, 1], [], []>} : vector<8x8xbf16>, vector<8x8xbf16>, vector<8x8xf32> -> vector<8x8xf32>
    "tpu.trace_stop"() : () -> ()
    %164 = arith.truncf %163 : vector<8x8xf32> to vector<8x8xbf16>
    %165 = vector.extract_strided_slice %6 {offsets = [8, 24], sizes = [8, 8], strides = [1, 1]} : vector<16x96xf32> to vector<8x8xf32>
    %166 = arith.truncf %165 : vector<8x8xf32> to vector<8x8xbf16>
    %167 = vector.extract_strided_slice %6 {offsets = [8, 56], sizes = [8, 8], strides = [1, 1]} : vector<16x96xf32> to vector<8x8xf32>
    %168 = arith.truncf %167 : vector<8x8xf32> to vector<8x8xbf16>
    %169 = vector.extract_strided_slice %6 {offsets = [8, 88], sizes = [8, 8], strides = [1, 1]} : vector<16x96xf32> to vector<8x8xf32>
    %170 = arith.truncf %169 : vector<8x8xf32> to vector<8x8xbf16>
    "tpu.trace_start"() <{level = 10 : i32, message = "qd,kd->qk"}> : () -> ()
    %cst_40 = arith.constant dense<0.000000e+00> : vector<8x8xf32>
    %171 = tpu.matmul %166, %168, %cst_40 {dimension_numbers = #tpu.dot_dimension_numbers<[1], [1], [0], [0], [0, 0, 1, 0], [], []>} : vector<8x8xbf16>, vector<8x8xbf16>, vector<8x8xf32> -> vector<8x8xf32>
    %cst_41 = arith.constant -1.000000e+30 : f32
    "tpu.trace_stop"() : () -> ()
    %172 = vector.broadcast %cst_41 : f32 to vector<8x8xf32>
    %173 = arith.select %9, %171, %172 : vector<8x8xi1>, vector<8x8xf32>
    %cst_42 = arith.constant dense<0xFF800000> : vector<8xf32>
    %174 = vector.multi_reduction <maximumf>, %173, %cst_42 [1] : vector<8x8xf32> to vector<8xf32>
    %175 = vector.shape_cast %174 : vector<8xf32> to vector<8x1xf32>
    %176 = vector.broadcast %175 : vector<8x1xf32> to vector<8x8xf32>
    %177 = arith.subf %173, %176 : vector<8x8xf32>
    %178 = math.exp %177 : vector<8x8xf32>
    %cst_43 = arith.constant dense<0.000000e+00> : vector<8xf32>
    %179 = vector.multi_reduction <add>, %178, %cst_43 [1] : vector<8x8xf32> to vector<8xf32>
    %180 = vector.shape_cast %179 : vector<8xf32> to vector<8x1xf32>
    %181 = tpu.reciprocal %180 {approx = true} : vector<8x1xf32> -> vector<8x1xf32>
    %182 = vector.broadcast %181 : vector<8x1xf32> to vector<8x8xf32>
    %183 = arith.mulf %178, %182 : vector<8x8xf32>
    %184 = arith.truncf %183 : vector<8x8xf32> to vector<8x8xbf16>
    "tpu.trace_start"() <{level = 10 : i32, message = "qk,kd->qd"}> : () -> ()
    %cst_44 = arith.constant dense<0.000000e+00> : vector<8x8xf32>
    %185 = tpu.matmul %184, %170, %cst_44 {dimension_numbers = #tpu.dot_dimension_numbers<[1], [0], [0], [1], [0, 0, 1, 1], [], []>} : vector<8x8xbf16>, vector<8x8xbf16>, vector<8x8xf32> -> vector<8x8xf32>
    "tpu.trace_stop"() : () -> ()
    %186 = arith.truncf %185 : vector<8x8xf32> to vector<8x8xbf16>
    %187 = tpu.concatenate %120, %142, %164, %186 in 1 : vector<8x8xbf16>, vector<8x8xbf16>, vector<8x8xbf16>, vector<8x8xbf16> -> vector<8x32xbf16>
    %188 = tpu.concatenate %98, %187 in 0 : vector<8x32xbf16>, vector<8x32xbf16> -> vector<16x32xbf16>
    %c0_45 = arith.constant 0 : index
    %c0_46 = arith.constant 0 : index
    %189 = vector.load %arg4[%c0_45, %c0_46] : memref<32x32xbf16, #tpu.memory_space<vmem>>, vector<32x32xbf16>
    %cst_47 = arith.constant dense<0.000000e+00> : vector<16x32xf32>
    %190 = tpu.matmul %188, %189, %cst_47 {dimension_numbers = #tpu.dot_dimension_numbers<[1], [0], [0], [1], [0, 0, 1, 1], [], []>} : vector<16x32xbf16>, vector<32x32xbf16>, vector<16x32xf32> -> vector<16x32xf32>
    %c0_48 = arith.constant 0 : index
    %c0_49 = arith.constant 0 : index
    %191 = vector.load %arg5[%c0_48, %c0_49] : memref<1x32xbf16, #tpu.memory_space<vmem>>, vector<1x32xbf16>
    %192 = arith.extf %191 : vector<1x32xbf16> to vector<1x32xf32>
    %193 = vector.broadcast %192 : vector<1x32xf32> to vector<16x32xf32>
    %194 = arith.addf %190, %193 : vector<16x32xf32>
    %c0_50 = arith.constant 0 : index
    %c0_51 = arith.constant 0 : index
    %195 = vector.load %arg6[%c0_50, %c0_51] : memref<16x32xf32, #tpu.memory_space<vmem>>, vector<16x32xf32>
    tpu.vector_store %arg6[%c0_50, %c0_51], %194 {strides = array<i32>} : memref<16x32xf32, #tpu.memory_space<vmem>>, vector<16x32xf32>,
    return
  }
  func.func @transform_0(%arg0: i32) -> (i32, i32) {
    %c0_i32 = arith.constant 0 : i32
    %c0_i32_0 = arith.constant 0 : i32
    %c0_i32_1 = arith.constant 0 : i32
    return %c0_i32, %c0_i32_0 : i32, i32
  }
  func.func @transform_1(%arg0: i32) -> (i32, i32) {
    %c0_i32 = arith.constant 0 : i32
    %c0_i32_0 = arith.constant 0 : i32
    %c0_i32_1 = arith.constant 0 : i32
    return %c0_i32, %c0_i32_0 : i32, i32
  }
  func.func @transform_2(%arg0: i32) -> (i32, i32) {
    %c0_i32 = arith.constant 0 : i32
    %c0_i32_0 = arith.constant 0 : i32
    %c0_i32_1 = arith.constant 0 : i32
    return %c0_i32, %c0_i32_0 : i32, i32
  }
  func.func @transform_3(%arg0: i32) -> (i32, i32) {
    %c0_i32 = arith.constant 0 : i32
    %c0_i32_0 = arith.constant 0 : i32
    %c0_i32_1 = arith.constant 0 : i32
    return %c0_i32, %c0_i32_0 : i32, i32
  }
  func.func @transform_4(%arg0: i32) -> (i32, i32) {
    %c0_i32 = arith.constant 0 : i32
    %c0_i32_0 = arith.constant 0 : i32
    %c0_i32_1 = arith.constant 0 : i32
    return %c0_i32, %c0_i32_0 : i32, i32
  }
  func.func @transform_5(%arg0: i32) -> (i32, i32) {
    %c0_i32 = arith.constant 0 : i32
    %c0_i32_0 = arith.constant 0 : i32
    %c0_i32_1 = arith.constant 0 : i32
    return %c0_i32, %c0_i32_0 : i32, i32
  }
}

</mosaic_0001>

<bundles_post_ra>
// kernel: tpu_custom_call.1
= control target key start
LH: loop header
LB: loop body
LE: loop exit
PB: predicated region body
PF: predicated region fallthrough
CT: control target
= control target key end

     0   :  { %10 = vsyncpa [#allocation3], 0  ;;  %s1839_s0 = inlined_call_operand.hbm [shape: bf16[16,32], index: 0, kind: input, shape index: {}]   ;;  %s1840_s1 = inlined_call_operand.hbm [shape: bf16[32,96], index: 1, kind: input, shape index: {}]   ;;  %s1841_s2 = inlined_call_operand.vmem [shape: bf16[1,96], index: 2, kind: input, shape index: {}]   ;;  %s1842_s3 = inlined_call_operand.hbm [shape: bf16[32,32], index: 3, kind: input, shape index: {}]   ;;  %s1843_s4 = inlined_call_operand.vmem [shape: bf16[1,32], index: 4, kind: input, shape index: {}]   ;;  %s1844_s5 = inlined_call_operand.hbm [shape: f32[16,32], index: 5, kind: output, shape index: {}]  }
   0x1   :  { %11 = vsyncpa [#allocation6], 0 }
   0x2   :  { %12 = vsyncpa [#allocation4], 0  ;;  %s1489_s18 = smov [#allocation5]   ;;  %s1490_s20 = smov [#allocation2]  }
   0x3   :  { %s30_s19 = sshll.u32 %s1489_s18, 4  ;;  %s18_s21 = sshll.u32 %s1490_s20, 4  ;;  %s31_s19 = int_to_ptr.vmem [resolvable:$true] %s30_s19  ;;  %s1541_s21 = int_to_ptr.vmem [resolvable:$true] %s18_s21 }
   0x4   :  { %s1395_s24 = scalar_lea.hbm %s1840_s1, 256 }
   0x5   :  { %p1396_p0 = scmp.ne.s32.totalorder %s1840_s1, %s1395_s24  ;;  %p1399_p1 = scmp.lt.u32.totalorder %s1395_s24, %s1840_s1 }
   0x7   :  { %p1401_p2 = pnand %p1399_p1, %p1396_p0 }
   0x9   :  { %1404 = shalt.err (!%p1401_p2)
}
   0xa   :  { %s1405_s29 = scalar_lea.vmem %s31_s19, 256  ;;  %p1410_p4 = scmp.lt.s32.totalorder %s31_s19, %s31_s19 }
   0xb   :  { %p1406_p3 = scmp.ne.s32.totalorder %s31_s19, %s1405_s29  ;;  %p1411_p5 = scmp.lt.s32.totalorder %s1405_s29, %s1405_s29 }
   0xd   :  { %p1412_p6 = por %p1411_p5, %p1410_p4 }
   0xf   :  { %p1413_p7 = pnand %p1412_p6, %p1406_p3 }
  0x11   :  { %1416 = shalt.err (!%p1413_p7)
}
  0x12   :  { %s1491_s30 = smov 64   ;;  %s1492_s6 = smov 4  }
  0x13   :  { %36 = dma.hbm_to_vmem [thread:$0]  %s1840_s1, 256, %s31_s19, [#allocation6], %s1491_s30, %s1491_s30, %s1492_s6  }
  0x14   :  { %s1417_s11 = scalar_lea.hbm %s1839_s0, 128 }
  0x15   :  { %p1418_p8 = scmp.ne.s32.totalorder %s1839_s0, %s1417_s11  ;;  %p1421_p9 = scmp.lt.u32.totalorder %s1417_s11, %s1839_s0 }
  0x17   :  { %p1423_p10 = pnand %p1421_p9, %p1418_p8 }
  0x19   :  { %1426 = shalt.err (!%p1423_p10)
}
  0x1a   :  { %s1427_s16 = scalar_lea.vmem %s1541_s21, 128  ;;  %p1432_p12 = scmp.lt.s32.totalorder %s1541_s21, %s1541_s21 }
  0x1b   :  { %p1428_p11 = scmp.ne.s32.totalorder %s1541_s21, %s1427_s16  ;;  %p1433_p13 = scmp.lt.s32.totalorder %s1427_s16, %s1427_s16 }
  0x1d   :  { %p1434_p0 = por %p1433_p13, %p1432_p12 }
  0x1f   :  { %p1435_p1 = pnand %p1434_p0, %p1428_p11 }
  0x21   :  { %1438 = shalt.err (!%p1435_p1)
}
  0x22   :  { %24 = dma.hbm_to_vmem [thread:$0]  %s1839_s0, 128, %s1541_s21, [#allocation3], %s1491_s30, %s1491_s30, %s1492_s6  }
  0x23   :  { %s1493_s18 = smov [#allocation7]   ;;  %s1439_s23 = scalar_lea.hbm %s1842_s3, 256 }
  0x24   :  { %s44_s19 = sshll.u32 %s1493_s18, 4  ;;  %p1440_p2 = scmp.ne.s32.totalorder %s1842_s3, %s1439_s23  ;;  %s45_s19 = int_to_ptr.vmem [resolvable:$true] %s44_s19 }
  0x25   :  { %p1443_p3 = scmp.lt.u32.totalorder %s1439_s23, %s1842_s3 }
  0x27   :  { %p1445_p4 = pnand %p1443_p3, %p1440_p2 }
  0x29   :  { %1448 = shalt.err (!%p1445_p4)
}
  0x2a   :  { %s1449_s28 = scalar_lea.vmem %s45_s19, 256  ;;  %p1454_p6 = scmp.lt.s32.totalorder %s45_s19, %s45_s19 }
  0x2b   :  { %p1450_p5 = scmp.ne.s32.totalorder %s45_s19, %s1449_s28  ;;  %p1455_p7 = scmp.lt.s32.totalorder %s1449_s28, %s1449_s28 }
  0x2d   :  { %p1456_p8 = por %p1455_p7, %p1454_p6 }
  0x2f   :  { %p1457_p9 = pnand %p1456_p8, %p1450_p5 }
  0x31   :  { %1460 = shalt.err (!%p1457_p9)
}
  0x32   :  { %50 = dma.hbm_to_vmem [thread:$0]  %s1842_s3, 256, %s45_s19, [#allocation6], %s1491_s30, %s1491_s30, %s1492_s6  }
  0x33   :  { %1483 = dma.done.wait [#allocation3], 128  }
  0x34   :  { %1484 = vsyncadd [#allocation3], 4294967168 }
  0x35   :  { %1485 = dma.done.wait [#allocation6], 512  }
  0x36   :  { %1486 = vsyncadd [#allocation6], 4294966784  ;;  %v1494_v0 = vmov 0.0   ;;  %vm1495_vm0 = vmmov 0   ;;  %v1358_v1 = vld [vmem:[#allocation5] sm:$0xff]   ;;  %v1359_v2 = vld [vmem:[#allocation5 + $0x8] sm:$0xff]   ;;  %v71_v4 = vlaneseq }
  0x37   :  { %1224 = vmatprep.subr.bf16.mxu0 %v1494_v0  ;;  %1228 = vmatprep.mubr.msk.bf16.mxu0 %vm1495_vm0, %v1494_v0  ;;  %v1360_v3 = vld [vmem:[#allocation2] sm:$0xff]   ;;  %vm92_vm1 = vcmask 261120   ;;  %s1496_s6 = smov 120   ;;  %s1497_s7 = smov 96   ;;  %vm146_vm2 = vcmask 64512   ;;  %vm211_vm4 = vcmask 1043456  }
  0x38   :  { %1232 = vmatprep.subr.bf16.mxu1 %v1494_v0  ;;  %1234 = vmatprep.mubr.msk.bf16.mxu1 %vm1495_vm0, %v1494_v0  ;;  %v1605_v5 = vshrl.u32 %v71_v4, 7  ;;  %v69_v6 = vld [vmem:[%s1841_s2] sm:$0x1]  ;;  %s1498_s2 = smov 80   ;;  %s1499_s8 = smov 88   ;;  %v140_v40 = vand.u32 127, %v71_v4 }
  0x39   :  { %1225 = vmatpush3.bf16.msra.mxu0 %v1358_v1  ;;  %v70_v7 = vunpack.c.l.bf16 %v69_v6  ;;  %s1500_s9 = smov 72   ;;  %s1501_s10 = smov 112   ;;  %vm607_vm5 = vcmask 195584   ;;  %vm604_vm6 = vcmask 130048  }
  0x3a   :  { %1226 = vmatprep.subr.bf16.mxu0 %v1494_v0  ;;  %v73_v8 = vsub.s32 0, %v1605_v5  ;;  %s1502_s11 = smov 104   ;;  %vm1675_vm3 = vcmp.ge.s32.totalorder %v1605_v5, %v140_v40  ;;  %s1503_s12 = smov 56  }
  0x3b   :  { %s1504_s13 = smov 48   ;;  %s1505_s14 = smov 40  }
  0x3c   :  { %v74_v9 = vrot.slane %v70_v7, %v73_v8  ;;  %s1507_s15 = smov 16   ;;  %s1508_s16 = smov 24  }
  0x3d   :  { %1227 = vmatpush3.bf16.msra.mxu0 %v1359_v2  ;;  %s1509_s18 = smov [#allocation8]  }
  0x3e   :  { %1238 = vmatprep.subr.bf16.mxu0 %v1494_v0  ;;  %s1150_s19 = sshll.u32 %s1509_s18, 4  ;;  %s1151_s19 = int_to_ptr.vmem [resolvable:$true] %s1150_s19 }
  0x3f   :  { %s1461_s20 = scalar_lea.vmem %s1151_s19, 256  ;;  %p1466_p11 = scmp.lt.s32.totalorder %s1151_s19, %s1151_s19 }
  0x40   :  { %1229 = vmatmul.mubr.msk.bf16.vlgmr.msra.gmra.mrb[0].mxu0 %vm92_vm1, %v1360_v3  ;;  %p1462_p10 = scmp.ne.s32.totalorder %s1151_s19, %s1461_s20  ;;  %p1467_p12 = scmp.lt.s32.totalorder %s1461_s20, %s1461_s20 }
  0x41   :  { %1240 = vmatprep.mubr.msk.bf16.mxu0 %vm1495_vm0, %v1494_v0 }
  0x42   :  { %p1468_p13 = por %p1467_p12, %p1466_p11 }
  0x44   :  { %p1469_p0 = pnand %p1468_p13, %p1462_p10 }
 0x113   :  { %v130_v10 = vpop.f32.mrb[0].mxu0 }
 0x114   :  { %v131_v11 = vadd.f32 %v130_v10, %v74_v9  ;;  %v1230_v12 = vpop.f32.mrb[1].mxu0 }
 0x115   :  { %v133_v13 = vpop.f32.mrb[2].mxu0 }
 0x116   :  { %v1613_v14 = vpack.c.bf16 %v131_v11, %v131_v11  ;;  %v1231_v15 = vpop.f32.mrb[3].mxu0  ;;  %v134_v16 = vadd.f32 %v133_v13, %v74_v9 }
 0x118   :  { %256 = vrot.lane.b32.xlu1 %v1613_v14, %s1496_s6  ;;  %144 = vrot.lane.b32.xlu0 %v1613_v14, %s1497_s7  ;;  %v1621_v17 = vpack.c.bf16 %v134_v16, %v134_v16 }
 0x11c   :  { %370 = vrot.lane.b32.xlu1 %v1613_v14, %s1498_s2  ;;  %258 = vrot.lane.b32.xlu0 %v1613_v14, %s1499_s8 }
 0x120   :  { %482 = vrot.lane.b32.xlu1 %v1613_v14, %s1500_s9  ;;  %368 = vrot.lane.b32.xlu0 %v1613_v14, %s1501_s10 }
 0x124   :  { %480 = vrot.lane.b32.xlu0 %v1613_v14, %s1502_s11  ;;  %612 = vrot.lane.b32.xlu1 %v1621_v17, %s1497_s7 }
 0x128   :  { %724 = vrot.lane.b32.xlu0 %v1621_v17, %s1499_s8  ;;  %722 = vrot.lane.b32.xlu1 %v1621_v17, %s1496_s6 }
 0x12c   :  { %836 = vrot.lane.b32.xlu0 %v1621_v17, %s1498_s2  ;;  %834 = vrot.lane.b32.xlu1 %v1621_v17, %s1501_s10 }
 0x130   :  { %948 = vrot.lane.b32.xlu0 %v1621_v17, %s1500_s9  ;;  %946 = vrot.lane.b32.xlu1 %v1621_v17, %s1502_s11 }
 0x18a   :  { %v145_v18 = vpop.permute.xlu0 %144  ;;  %v257_v21 = vpop.permute.xlu1 %256 }
 0x18b   :  { %v151_v19 = vsel %vm146_vm2, %v145_v18, 0 }
 0x18c   :  { %1233 = vmatpush3.bf16.xpose.msra.mxu1 %v151_v19 }
 0x18d   :  { %1244 = vmatprep.subr.bf16.mxu1 %v1494_v0 }
 0x18e   :  { %v259_v20 = vpop.permute.xlu0 %258  ;;  %v371_v23 = vpop.permute.xlu1 %370 }
 0x18f   :  { %v264_v22 = vsel %vm146_vm2, %v259_v20, 0  ;;  %v376_v24 = vsel %vm146_vm2, %v371_v23, 0 }
 0x192   :  { %v483_v25 = vpop.permute.xlu1 %482  ;;  %v369_v26 = vpop.permute.xlu0 %368 }
 0x193   :  { %1235 = vmatmul.mubr.msk.bf16.vlgmr.msra.gmra.mrb[0].mxu1 %vm146_vm2, %v1613_v14  ;;  %v488_v27 = vsel %vm146_vm2, %v483_v25, 0 }
 0x194   :  { %1245 = vmatpush3.bf16.xpose.msra.mxu1 %v264_v22  ;;  %1246 = vmatprep.mubr.msk.bf16.mxu1 %vm1495_vm0, %v1494_v0 }
 0x195   :  { %1256 = vmatprep.subr.bf16.mxu1 %v1494_v0 }
 0x196   :  { %v613_v28 = vpop.permute.xlu1 %612  ;;  %v481_v29 = vpop.permute.xlu0 %480 }
 0x197   :  { %v618_v30 = vsel %vm146_vm2, %v613_v28, 0 }
 0x19a   :  { %v725_v31 = vpop.permute.xlu0 %724  ;;  %v723_v34 = vpop.permute.xlu1 %722 }
 0x19b   :  { %1247 = vmatmul.mubr.msk.bf16.vlgmr.msra.gmra.mrb[4].mxu1 %vm146_vm2, %v257_v21  ;;  %v730_v32 = vsel %vm146_vm2, %v725_v31, 0 }
 0x19c   :  { %1257 = vmatpush3.bf16.xpose.msra.mxu1 %v376_v24  ;;  %1258 = vmatprep.mubr.msk.bf16.mxu1 %vm1495_vm0, %v1494_v0 }
 0x19d   :  { %1268 = vmatprep.subr.bf16.mxu1 %v1494_v0 }
 0x19e   :  { %v837_v33 = vpop.permute.xlu0 %836  ;;  %v835_v37 = vpop.permute.xlu1 %834 }
 0x19f   :  { %v842_v35 = vsel %vm146_vm2, %v837_v33, 0 }
 0x1a2   :  { %v949_v36 = vpop.permute.xlu0 %948  ;;  %v947_v39 = vpop.permute.xlu1 %946 }
 0x1a3   :  { %1259 = vmatmul.mubr.msk.bf16.vlgmr.msra.gmra.mrb[8].mxu1 %vm146_vm2, %v369_v26  ;;  %v954_v38 = vsel %vm146_vm2, %v949_v36, 0 }
 0x1a4   :  { %1269 = vmatpush3.bf16.xpose.msra.mxu1 %v488_v27  ;;  %1270 = vmatprep.mubr.msk.bf16.mxu1 %vm1495_vm0, %v1494_v0 }
 0x1a5   :  { %1280 = vmatprep.subr.bf16.mxu1 %v1494_v0 }
 0x1ab   :  { %1271 = vmatmul.mubr.msk.bf16.vlgmr.msra.gmra.mrb[12].mxu1 %vm146_vm2, %v481_v29 }
 0x1ac   :  { %1281 = vmatpush3.bf16.xpose.msra.mxu1 %v618_v30  ;;  %1282 = vmatprep.mubr.msk.bf16.mxu1 %vm1495_vm0, %v1494_v0 }
 0x1ad   :  { %1292 = vmatprep.subr.bf16.mxu1 %v1494_v0 }
 0x1b3   :  { %1283 = vmatmul.mubr.msk.bf16.vlgmr.msra.gmra.mrb[16].mxu1 %vm146_vm2, %v1621_v17 }
 0x1b4   :  { %1293 = vmatpush3.bf16.xpose.msra.mxu1 %v730_v32  ;;  %1294 = vmatprep.mubr.msk.bf16.mxu1 %vm1495_vm0, %v1494_v0 }
 0x1b5   :  { %1304 = vmatprep.subr.bf16.mxu1 %v1494_v0 }
 0x1bb   :  { %1295 = vmatmul.mubr.msk.bf16.vlgmr.msra.gmra.mrb[20].mxu1 %vm146_vm2, %v723_v34 }
 0x1bc   :  { %1305 = vmatpush3.bf16.xpose.msra.mxu1 %v842_v35  ;;  %1306 = vmatprep.mubr.msk.bf16.mxu1 %vm1495_vm0, %v1494_v0 }
 0x1bd   :  { %1316 = vmatprep.subr.bf16.mxu1 %v1494_v0 }
 0x1c3   :  { %1307 = vmatmul.mubr.msk.bf16.vlgmr.msra.gmra.mrb[24].mxu1 %vm146_vm2, %v835_v37 }
 0x1c4   :  { %1317 = vmatpush3.bf16.xpose.msra.mxu1 %v954_v38  ;;  %1318 = vmatprep.mubr.msk.bf16.mxu1 %vm1495_vm0, %v1494_v0 }
 0x1c5   :  { %1328 = vmatprep.subr.bf16.mxu1 %v1494_v0 }
 0x1cb   :  { %1319 = vmatmul.mubr.msk.bf16.vlgmr.msra.gmra.mrb[28].mxu1 %vm146_vm2, %v947_v39 }
 0x1cc   :  { %1332 = vmatprep.mubr.msk.bf16.mxu1 %vm1495_vm0, %v1494_v0 }
 0x266   :  { %v187_v42 = vpop.f32.mrb[0].mxu1 }
 0x267   :  { %v193_v43 = vsel %vm1675_vm3, %v187_v42, -1e+30  ;;  %v1236_v44 = vpop.f32.mrb[1].mxu1 }
 0x268   :  { %v190_v45 = vpop.f32.mrb[2].mxu1  ;;  %v194_v46 = vsel %vm146_vm2, %v193_v43, -inf }
 0x269   :  { %v1237_v47 = vpop.f32.mrb[3].mxu1  ;;  %195 = vmax.xlane.f32.xlu0 %v194_v46 }
 0x26e   :  { %v300_v48 = vpop.f32.mrb[4].mxu1 }
 0x26f   :  { %v306_v49 = vsel %vm1675_vm3, %v300_v48, -1e+30  ;;  %v1248_v50 = vpop.f32.mrb[5].mxu1 }
 0x270   :  { %v303_v51 = vpop.f32.mrb[6].mxu1  ;;  %v307_v52 = vsel %vm146_vm2, %v306_v49, -inf }
 0x271   :  { %v1249_v53 = vpop.f32.mrb[7].mxu1  ;;  %308 = vmax.xlane.f32.xlu1 %v307_v52 }
 0x276   :  { %v412_v54 = vpop.f32.mrb[8].mxu1 }
 0x277   :  { %v418_v55 = vsel %vm1675_vm3, %v412_v54, -1e+30  ;;  %v1260_v56 = vpop.f32.mrb[9].mxu1 }
 0x278   :  { %v415_v57 = vpop.f32.mrb[10].mxu1  ;;  %v419_v58 = vsel %vm146_vm2, %v418_v55, -inf }
 0x279   :  { %v1261_v59 = vpop.f32.mrb[11].mxu1  ;;  %420 = vmax.xlane.f32.xlu0 %v419_v58 }
 0x27e   :  { %v524_v60 = vpop.f32.mrb[12].mxu1 }
 0x27f   :  { %v1690_v61 = vsel %vm1675_vm3, %v524_v60, -1e+30  ;;  %v1272_v62 = vpop.f32.mrb[13].mxu1 }
 0x280   :  { %v527_v63 = vpop.f32.mrb[14].mxu1  ;;  %v531_v1 = vsel %vm146_vm2, %v1690_v61, -inf }
 0x281   :  { %v1273_v2 = vpop.f32.mrb[15].mxu1  ;;  %532 = vmax.xlane.f32.xlu0 %v531_v1 }
 0x286   :  { %v654_v3 = vpop.f32.mrb[16].mxu1 }
 0x287   :  { %v1696_v4 = vsel %vm1675_vm3, %v654_v3, -1e+30  ;;  %v1284_v6 = vpop.f32.mrb[17].mxu1 }
 0x288   :  { %v657_v7 = vpop.f32.mrb[18].mxu1  ;;  %v661_v9 = vsel %vm146_vm2, %v1696_v4, -inf }
 0x289   :  { %662 = vmax.xlane.f32.xlu1 %v661_v9  ;;  %v1285_v10 = vpop.f32.mrb[19].mxu1 }
 0x28e   :  { %v766_v11 = vpop.f32.mrb[20].mxu1 }
 0x28f   :  { %v1702_v12 = vsel %vm1675_vm3, %v766_v11, -1e+30  ;;  %v1296_v13 = vpop.f32.mrb[21].mxu1 }
 0x290   :  { %v769_v15 = vpop.f32.mrb[22].mxu1  ;;  %v773_v16 = vsel %vm146_vm2, %v1702_v12, -inf }
 0x291   :  { %774 = vmax.xlane.f32.xlu0 %v773_v16  ;;  %v1297_v18 = vpop.f32.mrb[23].mxu1 }
 0x296   :  { %v878_v19 = vpop.f32.mrb[24].mxu1 }
 0x297   :  { %v884_v20 = vsel %vm1675_vm3, %v878_v19, -1e+30  ;;  %v1308_v21 = vpop.f32.mrb[25].mxu1 }
 0x298   :  { %v881_v22 = vpop.f32.mrb[26].mxu1  ;;  %v885_v23 = vsel %vm146_vm2, %v884_v20, -inf }
 0x299   :  { %886 = vmax.xlane.f32.xlu1 %v885_v23  ;;  %v1309_v24 = vpop.f32.mrb[27].mxu1 }
 0x29e   :  { %v990_v25 = vpop.f32.mrb[28].mxu1 }
 0x29f   :  { %v1711_v26 = vsel %vm1675_vm3, %v990_v25, -1e+30  ;;  %v1320_v27 = vpop.f32.mrb[29].mxu1 }
 0x2a0   :  { %v993_v28 = vpop.f32.mrb[30].mxu1  ;;  %v997_v30 = vsel %vm146_vm2, %v1711_v26, -inf }
 0x2a1   :  { %v1321_v29 = vpop.f32.mrb[31].mxu1 }
 0x2a7   :  { %319 = vrot.lane.b32.xlu0 %v1613_v14, %s1503_s12 }
 0x2aa   :  { %206 = vrot.lane.b32.xlu1 %v1613_v14, %s1491_s30 }
 0x2c6   :  { %998 = vmax.xlane.f32.xlu0 %v997_v30 }
 0x2f6   :  { %v196_v31 = vpop.xlane.xlu0 %195 }
 0x2f7   :  { %v197_v32 = vsub.f32 %v193_v43, %v196_v31 }
 0x2f9   :  { %v198_v33 = vmul.f32 1.442695, %v197_v32 }
 0x2fb   :  { %1363 = vpow2.f32 %v198_v33 }
 0x2fe   :  { %v309_v34 = vpop.xlane.xlu1 %308 }
 0x2ff   :  { %v310_v35 = vsub.f32 %v306_v49, %v309_v34 }
 0x301   :  { %v311_v36 = vmul.f32 1.442695, %v310_v35 }
 0x303   :  { %1365 = vpow2.f32 %v311_v36 }
 0x305   :  { %v1719_v37 = vpop.eup %1363 }
 0x306   :  { %v421_v38 = vpop.xlane.xlu0 %420  ;;  %v200_v39 = vsel %vm146_vm2, %v1719_v37, 0.0 }
 0x307   :  { %v422_v40 = vsub.f32 %v418_v55, %v421_v38  ;;  %201 = vadd.xlane.f32.xlu1 %v200_v39 }
 0x309   :  { %v423_v41 = vmul.f32 1.442695, %v422_v40 }
 0x30b   :  { %1367 = vpow2.f32 %v423_v41 }
 0x30d   :  { %v1723_v42 = vpop.eup %1365 }
 0x30e   :  { %v313_v43 = vsel %vm146_vm2, %v1723_v42, 0.0  ;;  %v533_v49 = vpop.xlane.xlu0 %532 }
 0x30f   :  { %314 = vadd.xlane.f32.xlu0 %v313_v43  ;;  %v534_v51 = vsub.f32 %v1690_v61, %v533_v49 }
 0x311   :  { %v535_v52 = vmul.f32 1.442695, %v534_v51 }
 0x313   :  { %1369 = vpow2.f32 %v535_v52 }
 0x315   :  { %v1727_v44 = vpop.eup %1367 }
 0x316   :  { %v425_v45 = vsel %vm146_vm2, %v1727_v44, 0.0  ;;  %v663_v46 = vpop.xlane.xlu1 %662 }
 0x317   :  { %426 = vadd.xlane.f32.xlu1 %v425_v45  ;;  %v664_v53 = vsub.f32 %v1696_v4, %v663_v46 }
 0x319   :  { %v665_v56 = vmul.f32 1.442695, %v664_v53 }
 0x31b   :  { %1371 = vpow2.f32 %v665_v56 }
 0x31d   :  { %v1370_v59 = vpop.eup %1369 }
 0x31e   :  { %v775_v54 = vpop.xlane.xlu0 %774  ;;  %v537_v60 = vsel %vm146_vm2, %v1370_v59, 0.0 }
 0x31f   :  { %v776_v55 = vsub.f32 %v1702_v12, %v775_v54 }
 0x322   :  { %v320_v4 = vpop.permute.xlu0 %319 }
 0x323   :  { %v325_v19 = vsel %vm211_vm4, %v320_v4, 0 }
 0x325   :  { %431 = vrot.lane.b32.xlu0 %v1613_v14, %s1504_s13  ;;  %v1741_v62 = vpop.eup %1371 }
 0x326   :  { %v887_v47 = vpop.xlane.xlu1 %886  ;;  %v667_v63 = vsel %vm146_vm2, %v1741_v62, 0.0 }
 0x327   :  { %v888_v57 = vsub.f32 %v884_v20, %v887_v47 }
 0x328   :  { %543 = vrot.lane.b32.xlu1 %v1613_v14, %s1505_s14  ;;  %v777_v14 = vmul.f32 1.442695, %v776_v55 }
 0x329   :  { %v889_v58 = vmul.f32 1.442695, %v888_v57 }
 0x32a   :  { %v207_v48 = vpop.permute.xlu1 %206  ;;  %1373 = vpow2.f32 %v777_v14 }
 0x32b   :  { %v213_v50 = vsel %vm211_vm4, %v207_v48, 0  ;;  %1375 = vpow2.f32 %v889_v58 }
 0x32c   :  { %1239 = vmatpush3.bf16.msra.mxu0 %v213_v50 }
 0x32d   :  { %1250 = vmatprep.subr.bf16.mxu0 %v1494_v0 }
 0x334   :  { %v1743_v61 = vpop.eup %1373 }
 0x335   :  { %v1747_v1 = vpop.eup %1375  ;;  %v779_v2 = vsel %vm146_vm2, %v1743_v61, 0.0 }
 0x336   :  { %v891_v3 = vsel %vm146_vm2, %v1747_v1, 0.0 }
 0x344   :  { %538 = vadd.xlane.f32.xlu0 %v537_v60 }
 0x348   :  { %668 = vadd.xlane.f32.xlu0 %v667_v63 }
 0x34c   :  { %780 = vadd.xlane.f32.xlu1 %v779_v2  ;;  %892 = vadd.xlane.f32.xlu0 %v891_v3 }
 0x353   :  { %v999_v6 = vpop.xlane.xlu0 %998 }
 0x354   :  { %v1000_v7 = vsub.f32 %v1711_v26, %v999_v6 }
 0x356   :  { %v1001_v9 = vmul.f32 1.442695, %v1000_v7 }
 0x358   :  { %1377 = vpow2.f32 %v1001_v9 }
 0x35d   :  { %785 = vrot.lane.b32.xlu1 %v1621_v17, %s1503_s12 }
 0x361   :  { %897 = vrot.lane.b32.xlu1 %v1621_v17, %s1504_s13 }
 0x362   :  { %v1758_v10 = vpop.eup %1377 }
 0x363   :  { %v1003_v11 = vsel %vm146_vm2, %v1758_v10, 0.0 }
 0x364   :  { %1004 = vadd.xlane.f32.xlu0 %v1003_v11 }
 0x365   :  { %1009 = vrot.lane.b32.xlu1 %v1621_v17, %s1505_s14 }
 0x37a   :  { %673 = vrot.lane.b32.xlu0 %v1621_v17, %s1491_s30  ;;  %s1506_s30 = smov 8  }
 0x394   :  { %v202_v12 = vpop.xlane.xlu1 %201 }
 0x395   :  { %1379 = vrcp.f32 %v202_v12 }
 0x39c   :  { %v315_v13 = vpop.xlane.xlu0 %314 }
 0x39d   :  { %1381 = vrcp.f32 %v315_v13 }
 0x39f   :  { %v1380_v15 = vpop.eup %1379 }
 0x3a0   :  { %v204_v16 = vmul.f32 %v1380_v15, %v1719_v37  ;;  %v432_v22 = vpop.permute.xlu0 %431 }
 0x3a1   :  { %v437_v24 = vsel %vm211_vm4, %v432_v22, 0 }
 0x3a2   :  { %v205_v18 = vpack.c.bf16 %v204_v16, %v204_v16 }
 0x3a4   :  { %1241 = vmatmul.mubr.msk.bf16.vlgmr.msra.gmra.mrb[4].mxu0 %vm146_vm2, %v205_v18  ;;  %v427_v20 = vpop.xlane.xlu1 %426 }
 0x3a5   :  { %1251 = vmatpush3.bf16.msra.mxu0 %v325_v19  ;;  %1383 = vrcp.f32 %v427_v20  ;;  %1252 = vmatprep.mubr.msk.bf16.mxu0 %vm1495_vm0, %v1494_v0  ;;  %v1361_v20 = vld [vmem:[#allocation7] sm:$0xff]  }
 0x3a6   :  { %1262 = vmatprep.subr.bf16.mxu0 %v1494_v0  ;;  %1329 = vmatpush3.bf16.msra.mxu1 %v1361_v20 }
 0x3a7   :  { %v1382_v17 = vpop.eup %1381  ;;  %1330 = vmatprep.subr.bf16.mxu1 %v1494_v0 }
 0x3a8   :  { %v317_v21 = vmul.f32 %v1382_v17, %v1723_v42  ;;  %v544_v27 = vpop.permute.xlu1 %543 }
 0x3a9   :  { %v549_v29 = vsel %vm211_vm4, %v544_v27, 0 }
 0x3aa   :  { %v318_v23 = vpack.c.bf16 %v317_v21, %v317_v21 }
 0x3ac   :  { %1253 = vmatmul.mubr.msk.bf16.vlgmr.msra.gmra.mrb[8].mxu0 %vm146_vm2, %v318_v23 }
 0x3ad   :  { %1263 = vmatpush3.bf16.msra.mxu0 %v437_v24  ;;  %1264 = vmatprep.mubr.msk.bf16.mxu0 %vm1495_vm0, %v1494_v0 }
 0x3ae   :  { %1274 = vmatprep.subr.bf16.mxu0 %v1494_v0 }
 0x3af   :  { %v1384_v25 = vpop.eup %1383 }
 0x3b0   :  { %v429_v26 = vmul.f32 %v1384_v25, %v1727_v44  ;;  %v1362_v25 = vld [vmem:[#allocation7 + $0x8] sm:$0xff]  }
 0x3b1   :  { %1331 = vmatpush3.bf16.msra.mxu1 %v1362_v25 }
 0x3b2   :  { %v430_v28 = vpack.c.bf16 %v429_v26, %v429_v26 }
 0x3b4   :  { %1265 = vmatmul.mubr.msk.bf16.vlgmr.msra.gmra.mrb[12].mxu0 %vm146_vm2, %v430_v28 }
 0x3b5   :  { %1275 = vmatpush3.bf16.msra.mxu0 %v549_v29  ;;  %1276 = vmatprep.mubr.msk.bf16.mxu0 %vm1495_vm0, %v1494_v0 }
 0x3b6   :  { %1286 = vmatprep.subr.bf16.mxu0 %v1494_v0 }
 0x3d1   :  { %v539_v30 = vpop.xlane.xlu0 %538 }
 0x3d2   :  { %1385 = vrcp.f32 %v539_v30 }
 0x3d5   :  { %v669_v34 = vpop.xlane.xlu0 %668 }
 0x3d6   :  { %1387 = vrcp.f32 %v669_v34 }
 0x3d9   :  { %v781_v35 = vpop.xlane.xlu1 %780  ;;  %v893_v36 = vpop.xlane.xlu0 %892 }
 0x3da   :  { %1389 = vrcp.f32 %v781_v35 }
 0x3db   :  { %1391 = vrcp.f32 %v893_v36 }
 0x3dc   :  { %v1386_v31 = vpop.eup %1385 }
 0x3dd   :  { %v541_v32 = vmul.f32 %v1386_v31, %v1370_v59  ;;  %v786_v42 = vpop.permute.xlu1 %785 }
 0x3de   :  { %v791_v45 = vsel %vm211_vm4, %v786_v42, 0 }
 0x3df   :  { %v542_v33 = vpack.c.bf16 %v541_v32, %v541_v32 }
 0x3e0   :  { %v1388_v37 = vpop.eup %1387 }
 0x3e1   :  { %1277 = vmatmul.mubr.msk.bf16.vlgmr.msra.gmra.mrb[16].mxu0 %vm146_vm2, %v542_v33  ;;  %v671_v39 = vmul.f32 %v1388_v37, %v1741_v62  ;;  %v898_v47 = vpop.permute.xlu1 %897 }
 0x3e2   :  { %1288 = vmatprep.mubr.msk.bf16.mxu0 %vm1495_vm0, %v1494_v0  ;;  %v903_v50 = vsel %vm211_vm4, %v898_v47, 0 }
 0x3e3   :  { %v672_v43 = vpack.c.bf16 %v671_v39, %v671_v39 }
 0x3e4   :  { %v1390_v44 = vpop.eup %1389 }
 0x3e5   :  { %v783_v46 = vmul.f32 %v1390_v44, %v1743_v61  ;;  %v1392_v49 = vpop.eup %1391  ;;  %v1010_v52 = vpop.permute.xlu1 %1009 }
 0x3e6   :  { %v895_v51 = vmul.f32 %v1392_v49, %v1747_v1  ;;  %v1015_v55 = vsel %vm211_vm4, %v1010_v52, 0  ;;  %v1082_v52 = vld [vmem:[%s1843_s4] sm:$0x1] }
 0x3e7   :  { %v784_v48 = vpack.c.bf16 %v783_v46, %v783_v46 }
 0x3e8   :  { %v896_v53 = vpack.c.bf16 %v895_v51, %v895_v51 }
 0x3f1   :  { %v1005_v38 = vpop.xlane.xlu0 %1004 }
 0x3f2   :  { %1393 = vrcp.f32 %v1005_v38 }
 0x3f5   :  { %v674_v40 = vpop.permute.xlu0 %673 }
 0x3f6   :  { %v679_v41 = vsel %vm211_vm4, %v674_v40, 0 }
 0x3f7   :  { %1287 = vmatpush3.bf16.msra.mxu0 %v679_v41 }
 0x3f8   :  { %1298 = vmatprep.subr.bf16.mxu0 %v1494_v0 }
 0x3fa   :  { %1289 = vmatmul.mubr.msk.bf16.vlgmr.msra.gmra.mrb[20].mxu0 %vm146_vm2, %v672_v43 }
 0x3fb   :  { %1299 = vmatpush3.bf16.msra.mxu0 %v791_v45  ;;  %1300 = vmatprep.mubr.msk.bf16.mxu0 %vm1495_vm0, %v1494_v0 }
 0x3fc   :  { %1310 = vmatprep.subr.bf16.mxu0 %v1494_v0  ;;  %v1394_v54 = vpop.eup %1393 }
 0x3fd   :  { %v1007_v56 = vmul.f32 %v1394_v54, %v1758_v10 }
 0x3ff   :  { %v1008_v57 = vpack.c.bf16 %v1007_v56, %v1007_v56 }
 0x402   :  { %1301 = vmatmul.mubr.msk.bf16.vlgmr.msra.gmra.mrb[24].mxu0 %vm146_vm2, %v784_v48 }
 0x403   :  { %1311 = vmatpush3.bf16.msra.mxu0 %v903_v50  ;;  %1312 = vmatprep.mubr.msk.bf16.mxu0 %vm1495_vm0, %v1494_v0 }
 0x404   :  { %1322 = vmatprep.subr.bf16.mxu0 %v1494_v0 }
 0x40a   :  { %1313 = vmatmul.mubr.msk.bf16.vlgmr.msra.gmra.mrb[28].mxu0 %vm146_vm2, %v896_v53  ;;  %v1083_v53 = vunpack.c.l.bf16 %v1082_v52 }
 0x40b   :  { %1323 = vmatpush3.bf16.msra.mxu0 %v1015_v55  ;;  %1324 = vmatprep.mubr.msk.bf16.mxu0 %vm1495_vm0, %v1494_v0 }
 0x40c   :  { %v1087_v54 = vrot.slane %v1083_v53, %v73_v8 }
 0x412   :  { %1325 = vmatmul.mubr.msk.bf16.vlgmr.msra.gmra.mrb[32].mxu0 %vm146_vm2, %v1008_v57 }
 0x477   :  { %v1808_v14 = vpop.f32.mrb[4].mxu0 }
 0x478   :  { %v1242_v58 = vpop.f32.mrb[5].mxu0  ;;  %v255_v43 = vpack.c.bf16 %v1808_v14, %v1808_v14 }
 0x479   :  { %v252_v59 = vpop.f32.mrb[6].mxu0 }
 0x47a   :  { %v1243_v60 = vpop.f32.mrb[7].mxu0 }
 0x47f   :  { %v361_v62 = vpop.f32.mrb[8].mxu0 }
 0x480   :  { %v367_v61 = vpack.c.bf16 %v361_v62, %v361_v62  ;;  %v1254_v63 = vpop.f32.mrb[9].mxu0 }
 0x481   :  { %v364_v1 = vpop.f32.mrb[10].mxu0 }
 0x482   :  { %593 = vrot.lane.b32.xlu0 %v367_v61, %s1506_s30  ;;  %v1255_v2 = vpop.f32.mrb[11].mxu0 }
 0x487   :  { %v473_v3 = vpop.f32.mrb[12].mxu0 }
 0x488   :  { %v479_v4 = vpack.c.bf16 %v473_v3, %v473_v3  ;;  %v1266_v6 = vpop.f32.mrb[13].mxu0 }
 0x489   :  { %v476_v7 = vpop.f32.mrb[14].mxu0 }
 0x48a   :  { %596 = vrot.lane.b32.xlu0 %v479_v4, %s1507_s15  ;;  %v1267_v9 = vpop.f32.mrb[15].mxu0 }
 0x4b4   :  { %v585_v10 = vpop.f32.mrb[16].mxu0 }
 0x4b5   :  { %v1278_v11 = vpop.f32.mrb[17].mxu0  ;;  %v591_v0 = vpack.c.bf16 %v585_v10, %v585_v10 }
 0x4b6   :  { %v588_v12 = vpop.f32.mrb[18].mxu0 }
 0x4b7   :  { %v1279_v13 = vpop.f32.mrb[19].mxu0 }
 0x4cd   :  { %v715_v15 = vpop.f32.mrb[20].mxu0 }
 0x4ce   :  { %v1290_v16 = vpop.f32.mrb[21].mxu0  ;;  %v721_v38 = vpack.c.bf16 %v715_v15, %v715_v15 }
 0x4cf   :  { %v718_v18 = vpop.f32.mrb[22].mxu0 }
 0x4d0   :  { %v1291_v19 = vpop.f32.mrb[23].mxu0 }
 0x4d5   :  { %v827_v17 = vpop.f32.mrb[24].mxu0 }
 0x4d6   :  { %v833_v21 = vpack.c.bf16 %v827_v17, %v827_v17  ;;  %v1302_v22 = vpop.f32.mrb[25].mxu0 }
 0x4d7   :  { %v830_v23 = vpop.f32.mrb[26].mxu0 }
 0x4d8   :  { %1059 = vrot.lane.b32.xlu1 %v833_v21, %s1506_s30  ;;  %v1303_v24 = vpop.f32.mrb[27].mxu0 }
 0x4dd   :  { %v939_v26 = vpop.f32.mrb[28].mxu0 }
 0x4de   :  { %v945_v27 = vpack.c.bf16 %v939_v26, %v939_v26  ;;  %v1314_v28 = vpop.f32.mrb[29].mxu0 }
 0x4df   :  { %v942_v29 = vpop.f32.mrb[30].mxu0 }
 0x4e0   :  { %1062 = vrot.lane.b32.xlu1 %v945_v27, %s1507_s15  ;;  %v1315_v30 = vpop.f32.mrb[31].mxu0 }
 0x4e5   :  { %v1051_v31 = vpop.f32.mrb[32].mxu0 }
 0x4e6   :  { %v1057_v32 = vpack.c.bf16 %v1051_v31, %v1051_v31  ;;  %v1326_v33 = vpop.f32.mrb[33].mxu0 }
 0x4e7   :  { %v1054_v34 = vpop.f32.mrb[34].mxu0 }
 0x4e8   :  { %1065 = vrot.lane.b32.xlu1 %v1057_v32, %s1508_s16  ;;  %v1327_v35 = vpop.f32.mrb[35].mxu0 }
 0x4ec   :  { %599 = vrot.lane.b32.xlu1 %v591_v0, %s1508_s16 }
 0x4f4   :  { %v594_v39 = vpop.permute.xlu0 %593 }
 0x4f5   :  { %v603_v46 = vsel %vm146_vm2, %v255_v43, %v594_v39 }
 0x4fc   :  { %v597_v44 = vpop.permute.xlu0 %596 }
 0x4fd   :  { %v606_v47 = vsel %vm604_vm6, %v603_v46, %v597_v44 }
 0x54a   :  { %v1060_v36 = vpop.permute.xlu1 %1059 }
 0x54b   :  { %v1069_v40 = vsel %vm146_vm2, %v721_v38, %v1060_v36 }
 0x552   :  { %v1063_v37 = vpop.permute.xlu1 %1062 }
 0x553   :  { %v1071_v41 = vsel %vm604_vm6, %v1069_v40, %v1063_v37 }
 0x55a   :  { %v1066_v42 = vpop.permute.xlu1 %1065 }
 0x55b   :  { %v1073_v45 = vsel %vm607_vm5, %v1071_v41, %v1066_v42 }
 0x55c   :  { %v1075_v48 = vrot.slane %v1073_v45, 4 }
 0x55e   :  { %v600_v49 = vpop.permute.xlu1 %599 }
 0x55f   :  { %v609_v50 = vsel %vm607_vm5, %v606_v47, %v600_v49 }
 0x560   :  { %v1077_v51 = vsel %vm211_vm4, %v609_v50, %v1075_v48 }
 0x561   :  { %1333 = vmatmul.mubr.msk.bf16.vlgmr.msra.gmra.mrb[32].mxu1 %vm92_vm1, %v1077_v51 }
 0x634   :  { %v1136_v55 = vpop.f32.mrb[32].mxu1 }
 0x635   :  { %v1137_v56 = vadd.f32 %v1136_v55, %v1087_v54  ;;  %v1334_v57 = vpop.f32.mrb[33].mxu1 }
 0x636   :  { %v1139_v14 = vpop.f32.mrb[34].mxu1 }
 0x637   :  { %1143 = vst.msk [vmem:[#allocation8] sm:$0xff] %vm92_vm1, %v1137_v56  ;;  %v1140_v58 = vadd.f32 %v1139_v14, %v1087_v54  ;;  %v1335_v59 = vpop.f32.mrb[35].mxu1 }
 0x639   :  { %1144 = vst.msk [vmem:[#allocation8 + $0x8] sm:$0xff] %vm92_vm1, %v1140_v58 }
 0x63a   :  { %1472 = shalt.err (!%p1469_p0)
}
 0x63b   :  { %s1473_s23 = scalar_lea.hbm %s1844_s5, 256 }
 0x63c   :  { %p1474_p1 = scmp.ne.s32.totalorder %s1844_s5, %s1473_s23  ;;  %p1477_p2 = scmp.lt.u32.totalorder %s1473_s23, %s1844_s5 }
 0x63e   :  { %p1479_p3 = pnand %p1477_p2, %p1474_p1 }
 0x640   :  { %1482 = shalt.err (!%p1479_p3)
}
 0x641   :  { %s1510_s28 = smov 128  }
 0x642   :  { %1156 = dma.vmem_to_hbm [thread:$0]  %s1151_s19, 256, %s1844_s5, [#allocation4], %s1510_s28, %s1510_s28, %s1506_s30  }
 0x643   :  { %1487 = dma.done.wait [#allocation4], 256  }
 0x644   :  { %1488 = vsyncadd [#allocation4], 4294967040 }
 0x645   :  { %1160 = vsyncpa [#allocation3], 1 }
 0x646   :  { %1161 = vsyncpa [#allocation6], 1 }
 0x647   :  { %1162 = vsyncpa [#allocation4], 1 }

</bundles_post_ra>
